<compile_context>
chip_gen: v7x
topology: tpu7x:2x2x1
jax: 0.10.0
libtpu: 0.0.40
codegen_flags: <defaults>
</compile_context>

<pallas_src>
import functools

import jax
import jax.numpy as jnp
from jax.experimental import pallas as pl
from jax.experimental.pallas import tpu as pltpu


def _chip_budgets():
    """(vmem_limit_bytes, per_block_bytes) derived from the device generation."""
    try:
        cap = int(pltpu.get_tpu_info().vmem_capacity_bytes)
    except Exception:  # pragma: no cover - conservative fallback
        cap = 64 * 1024 * 1024
    if cap >= 96 * 1024 * 1024:          # v5e / v6e class (128 MiB physical)
        return 64 * 1024 * 1024, 8 * 1024 * 1024
    return 48 * 1024 * 1024, 4 * 1024 * 1024  # v7x class (64 MiB physical)


def _pick_tiles(nc, hw, elem_bytes, block_bytes):
    """Pick (row_tile, lane_tile) for streaming a (nc, hw) array."""
    min_rows = min(nc, 8)
    if hw % 128 == 0:
        # Largest 128-multiple lane tile under budget that divides HW exactly.
        cap = max(128, (block_bytes // (min_rows * elem_bytes)) // 128 * 128)
        tm = min(cap, hw)
        while hw % tm:
            tm -= 128
    elif min_rows * hw * elem_bytes <= block_bytes:
        # Ragged HW but a full-extent lane tile fits: always-legal block shape,
        # rows still tiled so pipelining/double-buffering is preserved.
        tm = hw
    else:
        # Large ragged HW: 128-multiple tile + cdiv grid.  Pass 1 masks the
        # tail lanes; pass 2 relies on clipped edge-block writeback.
        cap = max(128, (block_bytes // (min_rows * elem_bytes)) // 128 * 128)
        tm = min(cap, max(128, (hw // 128) * 128))
    # Rows: full extent when it fits (also the nc < 8 case), else a multiple
    # of 8.  The second bound keeps the (r, 128) f32 accumulators <= one block.
    row_budget = max(1, min(block_bytes // (tm * elem_bytes),
                            block_bytes // (128 * 4 * 2)))
    if nc <= row_budget:
        r = nc
    else:
        r = max(8, (row_budget // 8) * 8)
    return r, tm


def _x_input_spec(block_shape, index_map, n_lane_tiles):
    """Pass-1 x spec; request 3-deep buffering when it can actually help."""
    if n_lane_tiles >= 3 and hasattr(pl, "Buffered"):
        try:
            return pl.BlockSpec(block_shape, index_map,
                                pipeline_mode=pl.Buffered(3))
        except TypeError:   # older BlockSpec signature: fall back to default
            pass
    return pl.BlockSpec(block_shape, index_map)


def _stats_kernel(x_ref, sum_ref, sq_ref, sum_acc, sq_acc, *, hw, tm):
    """Per-row partial sum / sum-of-squares over the lane-tile axis."""
    j = pl.program_id(1)

    @pl.when(j == 0)
    def _init():
        sum_acc[...] = jnp.zeros_like(sum_acc)
        sq_acc[...] = jnp.zeros_like(sq_acc)

    x = x_ref[...].astype(jnp.float32)                     # (R, TM)

    if hw % tm != 0:
        # Ragged tail: zero out-of-range lanes before accumulating (mask is a
        # select, so padded garbage/NaN never propagates).
        lane = jax.lax.broadcasted_iota(jnp.int32, x.shape, 1)
        x = jnp.where(j * tm + lane < hw, x, 0.0)

    if tm % 128 == 0:
        # Fold lane slices into one 128-lane strip (static, lane-aligned
        # slices, pure VALU) so the accumulator RMW happens once per tile.
        s = x[:, :128]
        q = s * s
        for g in range(1, tm // 128):
            xg = x[:, g * 128:(g + 1) * 128]
            s = s + xg
            q = q + xg * xg
    else:
        s = x
        q = x * x
    sum_acc[...] += s
    sq_acc[...] += q

    @pl.when(j == pl.num_programs(1) - 1)
    def _finalize():
        # Single deferred cross-lane (XLU) reduce per row tile.
        sum_ref[...] = jnp.sum(sum_acc[...], axis=-1, keepdims=True)
        sq_ref[...] = jnp.sum(sq_acc[...], axis=-1, keepdims=True)


def _norm_kernel(x_ref, scale_ref, shift_ref, o_ref):
    x = x_ref[...].astype(jnp.float32)                     # (R, TM)
    o_ref[...] = (x * scale_ref[...] + shift_ref[...]).astype(o_ref.dtype)


def my_batch_norm_2d(x, gamma, beta, running_mean, running_var,
                     eps=1e-5, momentum=0.1, block_bytes=None):
    """Training-mode BatchNorm2d forward (add_noise=False).

    x: (N, C, H, W).  Returns (out, new_running_mean, new_running_var).
    """
    N, C, H, W = x.shape
    NC, HW = N * C, H * W
    M = N * HW                                  # elements per channel

    vmem_limit, default_block = _chip_budgets()
    if block_bytes is None:
        block_bytes = default_block
    elem_bytes = x.dtype.itemsize               # dtype-aware tile sizing

    x_flat = x.reshape(NC, HW)                  # free view, no transpose
    r, tm = _pick_tiles(NC, HW, elem_bytes, block_bytes)
    acc_w = 128 if tm % 128 == 0 else tm
    n_row_tiles = pl.cdiv(NC, r)
    n_lane_tiles = pl.cdiv(HW, tm)
    grid = (n_row_tiles, n_lane_tiles)

    # ---- Pass 1: per-row partial sums (row axis parallel) ------------------
    p_sum, p_sq = pl.pallas_call(
        functools.partial(_stats_kernel, hw=HW, tm=tm),
        out_shape=(jax.ShapeDtypeStruct((NC, 1), jnp.float32),
                   jax.ShapeDtypeStruct((NC, 1), jnp.float32)),
        grid_spec=pltpu.PrefetchScalarGridSpec(
            num_scalar_prefetch=0,
            grid=grid,
            in_specs=[_x_input_spec((r, tm), lambda i, j: (i, j),
                                    n_lane_tiles)],
            out_specs=[pl.BlockSpec((r, 1), lambda i, j: (i, 0)),
                       pl.BlockSpec((r, 1), lambda i, j: (i, 0))],
            scratch_shapes=[pltpu.VMEM((r, acc_w), jnp.float32),
                            pltpu.VMEM((r, acc_w), jnp.float32)],
        ),
        compiler_params=pltpu.CompilerParams(
            dimension_semantics=("parallel", "arbitrary"),
            vmem_limit_bytes=vmem_limit,
        ),
    )(x_flat)

    # ---- Tiny cross-N combine + scale/shift (plain XLA, O(N*C)) ------------
    ch_sum = p_sum.reshape(N, C).sum(axis=0)
    ch_sq = p_sq.reshape(N, C).sum(axis=0)
    mean = ch_sum / M
    # Biased (ddof=0) variance, matching x.var([0,2,3], unbiased=False).
    var = jnp.maximum(ch_sq / M - mean * mean, 0.0)
    inv_std = jax.lax.rsqrt(var + eps)
    scale = gamma.astype(jnp.float32) * inv_std             # (C,)
    shift = beta.astype(jnp.float32) - mean * scale         # (C,)
    scale_rows = jnp.tile(scale, (N,)).reshape(NC, 1)       # per flattened row
    shift_rows = jnp.tile(shift, (N,)).reshape(NC, 1)

    # ---- Pass 2: normalize, fully parallel grid -----------------------------
    out_flat = pl.pallas_call(
        _norm_kernel,
        out_shape=jax.ShapeDtypeStruct((NC, HW), x.dtype),
        grid_spec=pltpu.PrefetchScalarGridSpec(
            num_scalar_prefetch=0,
            grid=grid,
            in_specs=[pl.BlockSpec((r, tm), lambda i, j: (i, j)),
                      pl.BlockSpec((r, 1), lambda i, j: (i, 0)),
                      pl.BlockSpec((r, 1), lambda i, j: (i, 0))],
            out_specs=pl.BlockSpec((r, tm), lambda i, j: (i, j)),
        ),
        compiler_params=pltpu.CompilerParams(
            dimension_semantics=("parallel", "parallel"),
            vmem_limit_bytes=vmem_limit,
        ),
    )(x_flat, scale_rows, shift_rows)

    out = out_flat.reshape(N, C, H, W)
    new_running_mean = (1.0 - momentum) * running_mean + momentum * mean
    new_running_var = (1.0 - momentum) * running_var + momentum * var
    return out, new_running_mean, new_running_var


def _reference(x, gamma, beta, rm, rv, eps, momentum):
    """Plain-JAX reference of the PyTorch semantics (training, no noise)."""
    xf = x.astype(jnp.float32)
    bm = xf.mean(axis=(0, 2, 3))
    bv = xf.var(axis=(0, 2, 3))
    x_hat = (xf - bm.reshape(1, -1, 1, 1)) / jnp.sqrt(
        bv.reshape(1, -1, 1, 1) + eps)
    out = gamma.reshape(1, -1, 1, 1) * x_hat + beta.reshape(1, -1, 1, 1)
    new_rm = (1 - momentum) * rm + momentum * bm
    new_rv = (1 - momentum) * rv + momentum * bv
    return out, new_rm, new_rv


if __name__ == "__main__":
    key = jax.random.PRNGKey(0)
    eps, momentum = 1e-5, 0.1

    configs = [
        # (N, C, H, W, dtype, block_bytes): None -> chip-derived budgets.
        (2, 4, 16, 16, jnp.float32, None),        # default budgets, single block
        (2, 4, 32, 32, jnp.float32, 16 * 1024),   # multi lane-tile: strip fold + carried acc
        (4, 16, 16, 16, jnp.float32, 8 * 1024),   # multi row-tile: parallel-row partials
        (2, 4, 20, 20, jnp.float32, None),        # ragged HW=400: full-extent lane tile
        (2, 8, 32, 32, jnp.bfloat16, 8 * 1024),   # bf16: dtype-aware tiling, 2x2 grid
    ]

    for (N, C, H, W, dtype, bb) in configs:
        kx, kg, kb, key = jax.random.split(key, 4)
        x = jax.random.normal(kx, (N, C, H, W), dtype=jnp.float32).astype(dtype)
        gamma = (1.0 + 0.1 * jax.random.normal(kg, (C,))).astype(jnp.float32)
        beta = (0.1 * jax.random.normal(kb, (C,))).astype(jnp.float32)
        running_mean = jnp.zeros((C,), jnp.float32)
        running_var = jnp.ones((C,), jnp.float32)
        # log_noise_std exists in the module but is unused when add_noise=False.

        out, new_rm, new_rv = my_batch_norm_2d(
            x, gamma, beta, running_mean, running_var,
            eps=eps, momentum=momentum, block_bytes=bb)
        jax.block_until_ready((out, new_rm, new_rv))

        out_ref, rm_ref, rv_ref = _reference(x, gamma, beta, running_mean,
                                             running_var, eps, momentum)
        tol = 3e-2 if dtype == jnp.bfloat16 else 1e-4
        assert jnp.allclose(out.astype(jnp.float32), out_ref,
                            atol=tol, rtol=tol), f"out mismatch {dtype}"
        assert jnp.allclose(new_rm, rm_ref, atol=1e-4, rtol=1e-4), "rm mismatch"
        assert jnp.allclose(new_rv, rv_ref, atol=1e-4, rtol=1e-4), "rv mismatch"

    print("KERNEL_OK")
</pallas_src>

<mosaic_0001>
module attributes {stable_mosaic.version = 11 : i64} {
  func.func @_stats_kernel(%arg0: i32, %arg1: i32, %arg2: memref<8x256xf32, #tpu.memory_space<vmem>>, %arg3: memref<8x1xf32, #tpu.memory_space<vmem>>, %arg4: memref<8x1xf32, #tpu.memory_space<vmem>>, %arg5: memref<8x128xf32, #tpu.memory_space<vmem>>, %arg6: memref<8x128xf32, #tpu.memory_space<vmem>>) attributes {dimension_semantics = [#tpu.dimension_semantics<parallel>, #tpu.dimension_semantics<arbitrary>], iteration_bounds = array<i64: 1, 1>, scalar_prefetch = 0 : i64, scratch_operands = 2 : i64, tpu.core_type = #tpu.core_type<tc>, window_params = [{transform_indices = @transform_0, window_bounds = array<i64: 8, 256>}, {transform_indices = @transform_1, window_bounds = array<i64: 8, 1>}, {transform_indices = @transform_2, window_bounds = array<i64: 8, 1>}]} {
    %c0_i32 = arith.constant 0 : i32
    %0 = arith.cmpi eq, %arg1, %c0_i32 : i32
    %1 = arith.extui %0 : i1 to i32
    %c0_i32_0 = arith.constant 0 : i32
    %2 = arith.cmpi ne, %1, %c0_i32_0 : i32
    scf.if %2 {
      %cst = arith.constant 0.000000e+00 : f32
      %19 = vector.broadcast %cst : f32 to vector<8x128xf32>
      %c0_12 = arith.constant 0 : index
      %c0_13 = arith.constant 0 : index
      %20 = vector.load %arg5[%c0_12, %c0_13] : memref<8x128xf32, #tpu.memory_space<vmem>>, vector<8x128xf32>
      tpu.vector_store %arg5[%c0_12, %c0_13], %19 {strides = array<i32>} : memref<8x128xf32, #tpu.memory_space<vmem>>, vector<8x128xf32>,
      %cst_14 = arith.constant 0.000000e+00 : f32
      %21 = vector.broadcast %cst_14 : f32 to vector<8x128xf32>
      %c0_15 = arith.constant 0 : index
      %c0_16 = arith.constant 0 : index
      %22 = vector.load %arg6[%c0_15, %c0_16] : memref<8x128xf32, #tpu.memory_space<vmem>>, vector<8x128xf32>
      tpu.vector_store %arg6[%c0_15, %c0_16], %21 {strides = array<i32>} : memref<8x128xf32, #tpu.memory_space<vmem>>, vector<8x128xf32>,
    } else {
    }
    %c0 = arith.constant 0 : index
    %c0_1 = arith.constant 0 : index
    %3 = vector.load %arg2[%c0, %c0_1] : memref<8x256xf32, #tpu.memory_space<vmem>>, vector<8x256xf32>
    %4 = vector.extract_strided_slice %3 {offsets = [0, 0], sizes = [8, 128], strides = [1, 1]} : vector<8x256xf32> to vector<8x128xf32>
    %5 = arith.mulf %4, %4 : vector<8x128xf32>
    %6 = vector.extract_strided_slice %3 {offsets = [0, 128], sizes = [8, 128], strides = [1, 1]} : vector<8x256xf32> to vector<8x128xf32>
    %7 = arith.addf %4, %6 : vector<8x128xf32>
    %8 = arith.mulf %6, %6 : vector<8x128xf32>
    %9 = arith.addf %5, %8 : vector<8x128xf32>
    %c0_2 = arith.constant 0 : index
    %c0_3 = arith.constant 0 : index
    %10 = vector.load %arg5[%c0_2, %c0_3] : memref<8x128xf32, #tpu.memory_space<vmem>>, vector<8x128xf32>
    %11 = arith.addf %10, %7 : vector<8x128xf32>
    %c0_4 = arith.constant 0 : index
    %c0_5 = arith.constant 0 : index
    %12 = vector.load %arg5[%c0_4, %c0_5] : memref<8x128xf32, #tpu.memory_space<vmem>>, vector<8x128xf32>
    tpu.vector_store %arg5[%c0_4, %c0_5], %11 {strides = array<i32>} : memref<8x128xf32, #tpu.memory_space<vmem>>, vector<8x128xf32>,
    %c0_6 = arith.constant 0 : index
    %c0_7 = arith.constant 0 : index
    %13 = vector.load %arg6[%c0_6, %c0_7] : memref<8x128xf32, #tpu.memory_space<vmem>>, vector<8x128xf32>
    %14 = arith.addf %13, %9 : vector<8x128xf32>
    %c0_8 = arith.constant 0 : index
    %c0_9 = arith.constant 0 : index
    %15 = vector.load %arg6[%c0_8, %c0_9] : memref<8x128xf32, #tpu.memory_space<vmem>>, vector<8x128xf32>
    tpu.vector_store %arg6[%c0_8, %c0_9], %14 {strides = array<i32>} : memref<8x128xf32, #tpu.memory_space<vmem>>, vector<8x128xf32>,
    %c0_i32_10 = arith.constant 0 : i32
    %16 = arith.cmpi eq, %arg1, %c0_i32_10 : i32
    %17 = arith.extui %16 : i1 to i32
    %c0_i32_11 = arith.constant 0 : i32
    %18 = arith.cmpi ne, %17, %c0_i32_11 : i32
    scf.if %18 {
      %c0_12 = arith.constant 0 : index
      %c0_13 = arith.constant 0 : index
      %19 = vector.load %arg5[%c0_12, %c0_13] : memref<8x128xf32, #tpu.memory_space<vmem>>, vector<8x128xf32>
      %cst = arith.constant dense<0.000000e+00> : vector<8xf32>
      %20 = vector.multi_reduction <add>, %19, %cst [1] : vector<8x128xf32> to vector<8xf32>
      %21 = vector.shape_cast %20 : vector<8xf32> to vector<8x1xf32>
      %c0_14 = arith.constant 0 : index
      %c0_15 = arith.constant 0 : index
      %22 = vector.load %arg3[%c0_14, %c0_15] : memref<8x1xf32, #tpu.memory_space<vmem>>, vector<8x1xf32>
      tpu.vector_store %arg3[%c0_14, %c0_15], %21 {strides = array<i32>} : memref<8x1xf32, #tpu.memory_space<vmem>>, vector<8x1xf32>,
      %c0_16 = arith.constant 0 : index
      %c0_17 = arith.constant 0 : index
      %23 = vector.load %arg6[%c0_16, %c0_17] : memref<8x128xf32, #tpu.memory_space<vmem>>, vector<8x128xf32>
      %cst_18 = arith.constant dense<0.000000e+00> : vector<8xf32>
      %24 = vector.multi_reduction <add>, %23, %cst_18 [1] : vector<8x128xf32> to vector<8xf32>
      %25 = vector.shape_cast %24 : vector<8xf32> to vector<8x1xf32>
      %c0_19 = arith.constant 0 : index
      %c0_20 = arith.constant 0 : index
      %26 = vector.load %arg4[%c0_19, %c0_20] : memref<8x1xf32, #tpu.memory_space<vmem>>, vector<8x1xf32>
      tpu.vector_store %arg4[%c0_19, %c0_20], %25 {strides = array<i32>} : memref<8x1xf32, #tpu.memory_space<vmem>>, vector<8x1xf32>,
    } else {
    }
    return
  }
  func.func @transform_0(%arg0: i32, %arg1: i32) -> (i32, i32) {
    %c0_i32 = arith.constant 0 : i32
    return %arg0, %arg1 : i32, i32
  }
  func.func @transform_1(%arg0: i32, %arg1: i32) -> (i32, i32) {
    %c0_i32 = arith.constant 0 : i32
    %c0_i32_0 = arith.constant 0 : i32
    return %arg0, %c0_i32 : i32, i32
  }
  func.func @transform_2(%arg0: i32, %arg1: i32) -> (i32, i32) {
    %c0_i32 = arith.constant 0 : i32
    %c0_i32_0 = arith.constant 0 : i32
    return %arg0, %c0_i32 : i32, i32
  }
}

</mosaic_0001>

<bundles_post_ra>
// kernel: tpu_custom_call.1
= control target key start
LH: loop header
LB: loop body
LE: loop exit
PB: predicated region body
PF: predicated region fallthrough
CT: control target
= control target key end

     0   :  { %8 = vsyncpa [#allocation5], 0  ;;  %s86_s9 = smov [#allocation4]   ;;  %s120_s0 = inlined_call_operand.hbm [shape: f32[8,256], index: 0, kind: input, shape index: {}]   ;;  %s121_s1 = inlined_call_operand.vmem [shape: f32[8,1], index: 1, kind: output, shape index: {0}]   ;;  %s122_s2 = inlined_call_operand.vmem [shape: f32[8,1], index: 2, kind: output, shape index: {1}]  }
   0x1   :  { %s15_s10 = sshll.u32 %s86_s9, 4  ;;  %s62_s13 = scalar_lea.hbm %s120_s0, 256  ;;  %s16_s10 = int_to_ptr.vmem [resolvable:$true] %s15_s10 }
   0x2   :  { %p63_p0 = scmp.ne.s32.totalorder %s120_s0, %s62_s13  ;;  %p66_p1 = scmp.lt.u32.totalorder %s62_s13, %s120_s0 }
   0x4   :  { %p68_p2 = pnand %p66_p1, %p63_p0 }
   0x6   :  { %71 = shalt.err (!%p68_p2)
}
   0x7   :  { %s72_s18 = scalar_lea.vmem %s16_s10, 256  ;;  %p77_p4 = scmp.lt.s32.totalorder %s16_s10, %s16_s10 }
   0x8   :  { %p73_p3 = scmp.ne.s32.totalorder %s16_s10, %s72_s18  ;;  %p78_p5 = scmp.lt.s32.totalorder %s72_s18, %s72_s18 }
   0xa   :  { %p79_p6 = por %p78_p5, %p77_p4 }
   0xc   :  { %p80_p7 = pnand %p79_p6, %p73_p3 }
   0xe   :  { %83 = shalt.err (!%p80_p7)
}
   0xf   :  { %18 = dma.hbm_to_vmem [thread:$0]  %s120_s0, 256, %s16_s10, [#allocation5]  }
  0x10   :  { %84 = dma.done.wait [#allocation5], 256  }
  0x11   :  { %85 = vsyncadd [#allocation5], 4294967040  ;;  %v28_v0 = vld [vmem:[#allocation4] sm:$0xff]  ;;  %v29_v1 = vld [vmem:[#allocation4 + $0x8] sm:$0xff]  ;;  %vm46_vm0 = vcmask 7168  }
  0x12   :  { %v31_v2 = vadd.f32 %v29_v1, %v28_v0  ;;  %v32_v3 = vmul.f32 %v29_v1, %v29_v1  ;;  %v30_v4 = vmul.f32 %v28_v0, %v28_v0 }
  0x14   :  { %44 = vadd.xlane.f32.xlu0 %v31_v2  ;;  %v33_v5 = vadd.f32 %v32_v3, %v30_v4 }
  0x18   :  { %49 = vadd.xlane.f32.xlu0 %v33_v5 }
  0xa1   :  { %v45_v6 = vpop.xlane.xlu0 %44 }
  0xa2   :  { %47 = vst.msk [vmem:[%s121_s1] sm:$0xff] %vm46_vm0, %v45_v6 }
  0xa5   :  { %v50_v7 = vpop.xlane.xlu0 %49 }
  0xa6   :  { %51 = vst.msk [vmem:[%s122_s2] sm:$0xff] %vm46_vm0, %v50_v7 }
  0xa7   :  { %60 = vsyncpa [#allocation5], 1 }

</bundles_post_ra>
